<compile_context>
chip_gen: v7x
topology: tpu7x:2x2x1
jax: 0.10.0
libtpu: 0.0.40
codegen_flags: <defaults>
</compile_context>

<pallas_src>
import functools

import jax
import jax.numpy as jnp
from jax import lax
from jax.experimental import pallas as pl
from jax.experimental.pallas import tpu as pltpu

BN_EPS = 1e-4      # nn.BatchNorm1d(eps=0.0001)
LANE = 128
_META_ROWS = 8     # slab rows 0..7: bn1(g,b), bn2(g,b), head bias, mean mask, pad


def _round_up(v, m):
    return ((v + m - 1) // m) * m


def _ladder_fc_kernel(x_ref, w1_ref, w2_ref, p_ref, out_ref, *, h1, h2):
    """One grid step: (IPB, B, D) -> (IPB, B, W) = [mean | sigmoid(std) | pad]."""
    ipb, b, d = x_ref.shape
    rows = ipb * b
    out_w = out_ref.shape[-1]
    x = x_ref[...].reshape(rows, d)

    def fc_bn_relu(inp, w_ref, gamma, beta, width):
        h = jnp.dot(inp, w_ref[...], preferred_element_type=jnp.float32)
        h3 = h.reshape(ipb, b, width)                    # per-instance view (free: B==8)
        mu = jnp.mean(h3, axis=1, keepdims=True)         # per-instance batch mean
        c = h3 - mu
        var = jnp.mean(c * c, axis=1, keepdims=True)     # biased (training-mode) variance
        scale = gamma.reshape(1, 1, width) * lax.rsqrt(var + BN_EPS)
        shift = beta.reshape(1, 1, width)
        return jnp.maximum(c * scale + shift, 0.0).reshape(rows, width)

    h = fc_bn_relu(x, w1_ref, p_ref[0:1, :h1], p_ref[1:2, :h1], h1)
    h = fc_bn_relu(h, w2_ref, p_ref[2:3, :h2], p_ref[3:4, :h2], h2)

    # Fused mean/std heads: single lane-dense MXU matmul, then blend with the
    # precomputed mean-lane mask (mask=1 -> identity, mask=0 -> sigmoid).
    w_head = p_ref[_META_ROWS:_META_ROWS + h2, :out_w]
    b_head = p_ref[4:5, :out_w]
    mask = p_ref[5:6, :out_w]
    y = jnp.dot(h, w_head, preferred_element_type=jnp.float32) + b_head
    sig = jax.nn.sigmoid(y)                              # single EUP logistic, no approx
    out_ref[...] = (sig + mask * (y - sig)).reshape(ipb, b, out_w)


def pack_params(params):
    """Pack the 10 LadderLayerFC parameters into 3 kernel operands.

    Done ONCE (outside the per-call path): returns (w1, w2, slab, meta) where
    slab is a single [8 + H2, W] f32 array holding the bn affine rows, the
    fused head bias, a 1/0 mean-lane mask, and the fused [H2, W] head weights
    (mean columns, then std columns, zero-padded to a full 128-lane width).
    """
    (w1, g1, b1, w2, g2, b2, wm, bm, ws, bs) = [
        jnp.asarray(p, jnp.float32) for p in params]
    d, h1 = w1.shape
    h2 = w2.shape[1]
    m_len = wm.shape[1]
    s_len = ws.shape[1]
    out_w = max(LANE, _round_up(m_len + s_len, LANE))
    width = max(out_w, _round_up(h1, LANE), _round_up(h2, LANE))

    slab = jnp.zeros((_META_ROWS + h2, width), jnp.float32)
    slab = slab.at[0, :h1].set(g1.reshape(-1))
    slab = slab.at[1, :h1].set(b1.reshape(-1))
    slab = slab.at[2, :h2].set(g2.reshape(-1))
    slab = slab.at[3, :h2].set(b2.reshape(-1))
    slab = slab.at[4, :m_len].set(bm.reshape(-1))
    slab = slab.at[4, m_len:m_len + s_len].set(bs.reshape(-1))
    slab = slab.at[5, :m_len].set(1.0)                   # 1 = mean lane, 0 = std lane
    slab = slab.at[_META_ROWS:, :m_len].set(wm)
    slab = slab.at[_META_ROWS:, m_len:m_len + s_len].set(ws)

    meta = dict(h1=h1, h2=h2, mean_len=m_len, std_len=s_len, out_w=out_w)
    return (w1, w2, slab, meta)


def _pick_instances_per_block(n, b):
    """Amortize the ~0.35us/step overhead (target <=128 rows per step so the BN
    epilogue stays in the vreg file) while keeping >=2 grid steps when possible
    so v7x's two TensorCores both get work."""
    target = max(1, min(n, 128 // max(b, 1)))
    if n > 1:
        target = min(target, (n + 1) // 2)
    for cand in range(target, 0, -1):
        if n % cand == 0:
            return cand
    return 1


def ladder_layer_fc(x, packed):
    """LadderLayerFC forward.

    x: [B, num_inputs] (one batch) or [N, B, num_inputs] (N independent
    batches, each normalized with its own BN batch statistics -- identical to
    calling the PyTorch module N times).  Returns (mean, std).
    """
    w1, w2, slab, meta = packed
    single = x.ndim == 2
    if single:
        x = x[None]
    x = x.astype(jnp.float32)
    n, b, d = x.shape
    h1, h2 = meta["h1"], meta["h2"]
    m_len, s_len, out_w = meta["mean_len"], meta["std_len"], meta["out_w"]
    ipb = _pick_instances_per_block(n, b)

    def const_spec(shape, single_buffer):
        nd = len(shape)
        if single_buffer:
            return pl.BlockSpec(shape, lambda i, _n=nd: (0,) * _n,
                                pipeline_mode=pl.Buffered(1))
        return pl.BlockSpec(shape, lambda i, _n=nd: (0,) * _n)

    def run(single_buffer):
        return pl.pallas_call(
            functools.partial(_ladder_fc_kernel, h1=h1, h2=h2),
            out_shape=jax.ShapeDtypeStruct((n, b, out_w), jnp.float32),
            grid=(n // ipb,),
            in_specs=[
                pl.BlockSpec((ipb, b, d), lambda i: (i, 0, 0)),
                const_spec(w1.shape, single_buffer),
                const_spec(w2.shape, single_buffer),
                const_spec(slab.shape, single_buffer),
            ],
            out_specs=pl.BlockSpec((ipb, b, out_w), lambda i: (i, 0, 0)),
            compiler_params=pltpu.CompilerParams(
                dimension_semantics=("parallel",)),
        )(x, w1, w2, slab)

    try:
        # Grid-invariant params: single-buffer to drop pointless swap plumbing.
        out = run(single_buffer=True)
    except Exception:
        # Fallback if this JAX build rejects Buffered(1) on pallas_call specs.
        out = run(single_buffer=False)

    mean = out[:, :, :m_len]
    std = out[:, :, m_len:m_len + s_len]
    if single:
        mean, std = mean[0], std[0]
    return mean, std


def make_params(key, num_inputs, h1, h2, mean_len, std_len):
    ks = jax.random.split(key, 6)
    scale = 0.1
    w1 = scale * jax.random.normal(ks[0], (num_inputs, h1), jnp.float32)
    w2 = scale * jax.random.normal(ks[1], (h1, h2), jnp.float32)
    wm = scale * jax.random.normal(ks[2], (h2, mean_len), jnp.float32)
    bm = scale * jax.random.normal(ks[3], (1, mean_len), jnp.float32)
    ws = scale * jax.random.normal(ks[4], (h2, std_len), jnp.float32)
    bs = scale * jax.random.normal(ks[5], (1, std_len), jnp.float32)
    # BatchNorm affine params (gamma=1, beta=0 at init).
    g1 = jnp.ones((1, h1), jnp.float32)
    b1 = jnp.zeros((1, h1), jnp.float32)
    g2 = jnp.ones((1, h2), jnp.float32)
    b2 = jnp.zeros((1, h2), jnp.float32)
    return (w1, g1, b1, w2, g2, b2, wm, bm, ws, bs)


def reference(x, params):
    (w1, g1, b1, w2, g2, b2, wm, bm, ws, bs) = params

    def fc_bn_relu(h, w, g, b):
        h = h @ w
        mu = jnp.mean(h, axis=0, keepdims=True)
        var = jnp.mean((h - mu) ** 2, axis=0, keepdims=True)
        return jnp.maximum(g * (h - mu) / jnp.sqrt(var + BN_EPS) + b, 0.0)

    h = fc_bn_relu(x, w1, g1, b1)
    h = fc_bn_relu(h, w2, g2, b2)
    mean = h @ wm + bm
    std = jax.nn.sigmoid(h @ ws + bs)
    return mean, std


if __name__ == "__main__":
    N_INSTANCES = 4   # independent batches processed in ONE pallas_call
    B = 8             # batch per instance
    NUM_IN = 32       # config_1.num_inputs
    H1 = 64           # config_1.num_outputs
    H2 = 48           # config_2.num_outputs
    MEAN_LEN = 16     # config_3.mean_length
    STD_LEN = 16      # config_3.stddev_length

    key = jax.random.PRNGKey(0)
    kx, kp = jax.random.split(key)
    x = jax.random.normal(kx, (N_INSTANCES, B, NUM_IN), jnp.float32)
    params = make_params(kp, NUM_IN, H1, H2, MEAN_LEN, STD_LEN)
    packed = pack_params(params)          # packed ONCE, outside the call path
    jax.block_until_ready(packed[:3])

    mean, std = ladder_layer_fc(x, packed)
    jax.block_until_ready((mean, std))

    for n in range(N_INSTANCES):
        ref_mean, ref_std = reference(x[n], params)
        assert jnp.allclose(mean[n], ref_mean, atol=1e-4, rtol=1e-4), n
        assert jnp.allclose(std[n], ref_std, atol=5e-4, rtol=5e-4), n

    # Single-batch (2-D) path: identical to one PyTorch forward call.
    mean1, std1 = ladder_layer_fc(x[0], packed)
    jax.block_until_ready((mean1, std1))
    ref_mean, ref_std = reference(x[0], params)
    assert jnp.allclose(mean1, ref_mean, atol=1e-4, rtol=1e-4)
    assert jnp.allclose(std1, ref_std, atol=5e-4, rtol=5e-4)

    print("KERNEL_OK")
</pallas_src>

<mosaic_0001>
module attributes {stable_mosaic.version = 11 : i64} {
  func.func @_ladder_fc_kernel(%arg0: i32, %arg1: memref<2x8x32xf32, #tpu.memory_space<vmem>>, %arg2: memref<32x64xf32, #tpu.memory_space<vmem>>, %arg3: memref<64x48xf32, #tpu.memory_space<vmem>>, %arg4: memref<56x128xf32, #tpu.memory_space<vmem>>, %arg5: memref<2x8x128xf32, #tpu.memory_space<vmem>>) attributes {dimension_semantics = [#tpu.dimension_semantics<parallel>], iteration_bounds = array<i64: 2>, scalar_prefetch = 0 : i64, scratch_operands = 0 : i64, tpu.core_type = #tpu.core_type<tc>, window_params = [{transform_indices = @transform_0, window_bounds = array<i64: 2, 8, 32>}, {pipeline_mode = #tpu.pipeline_mode<synchronous>, transform_indices = @transform_1, window_bounds = array<i64: 32, 64>}, {pipeline_mode = #tpu.pipeline_mode<synchronous>, transform_indices = @transform_2, window_bounds = array<i64: 64, 48>}, {pipeline_mode = #tpu.pipeline_mode<synchronous>, transform_indices = @transform_3, window_bounds = array<i64: 56, 128>}, {transform_indices = @transform_4, window_bounds = array<i64: 2, 8, 128>}]} {
    %c0 = arith.constant 0 : index
    %c0_0 = arith.constant 0 : index
    %c0_1 = arith.constant 0 : index
    %0 = vector.load %arg1[%c0, %c0_0, %c0_1] : memref<2x8x32xf32, #tpu.memory_space<vmem>>, vector<2x8x32xf32>
    %1 = vector.shape_cast %0 : vector<2x8x32xf32> to vector<16x32xf32>
    %c0_2 = arith.constant 0 : index
    %c0_3 = arith.constant 0 : index
    %2 = vector.load %arg4[%c0_2, %c0_3] : memref<56x128xf32, #tpu.memory_space<vmem>>, vector<1x64xf32>
    %c1 = arith.constant 1 : index
    %c0_4 = arith.constant 0 : index
    %3 = vector.load %arg4[%c1, %c0_4] : memref<56x128xf32, #tpu.memory_space<vmem>>, vector<1x64xf32>
    %c0_5 = arith.constant 0 : index
    %c0_6 = arith.constant 0 : index
    %4 = vector.load %arg2[%c0_5, %c0_6] : memref<32x64xf32, #tpu.memory_space<vmem>>, vector<32x64xf32>
    %cst = arith.constant dense<0.000000e+00> : vector<16x64xf32>
    %5 = tpu.matmul %1, %4, %cst {dimension_numbers = #tpu.dot_dimension_numbers<[1], [0], [0], [1], [0, 0, 1, 1], [], []>} : vector<16x32xf32>, vector<32x64xf32>, vector<16x64xf32> -> vector<16x64xf32>
    %6 = vector.shape_cast %5 : vector<16x64xf32> to vector<2x8x64xf32>
    %cst_7 = arith.constant dense<0.000000e+00> : vector<2x64xf32>
    %7 = vector.multi_reduction <add>, %6, %cst_7 [1] : vector<2x8x64xf32> to vector<2x64xf32>
    %8 = vector.shape_cast %7 : vector<2x64xf32> to vector<2x1x64xf32>
    %cst_8 = arith.constant 8.000000e+00 : f32
    %9 = vector.broadcast %cst_8 : f32 to vector<2x1x64xf32>
    %10 = arith.divf %8, %9 : vector<2x1x64xf32>
    %11 = vector.broadcast %10 : vector<2x1x64xf32> to vector<2x8x64xf32>
    %12 = arith.subf %6, %11 : vector<2x8x64xf32>
    %13 = arith.mulf %12, %12 : vector<2x8x64xf32>
    %cst_9 = arith.constant dense<0.000000e+00> : vector<2x64xf32>
    %14 = vector.multi_reduction <add>, %13, %cst_9 [1] : vector<2x8x64xf32> to vector<2x64xf32>
    %15 = vector.shape_cast %14 : vector<2x64xf32> to vector<2x1x64xf32>
    %cst_10 = arith.constant 8.000000e+00 : f32
    %16 = vector.broadcast %cst_10 : f32 to vector<2x1x64xf32>
    %17 = arith.divf %15, %16 : vector<2x1x64xf32>
    %18 = vector.shape_cast %2 : vector<1x64xf32> to vector<1x1x64xf32>
    %cst_11 = arith.constant 9.99999974E-5 : f32
    %19 = vector.broadcast %cst_11 : f32 to vector<2x1x64xf32>
    %20 = arith.addf %17, %19 : vector<2x1x64xf32>
    %21 = math.rsqrt %20 : vector<2x1x64xf32>
    %22 = vector.broadcast %18 : vector<1x1x64xf32> to vector<2x1x64xf32>
    %23 = arith.mulf %22, %21 : vector<2x1x64xf32>
    %24 = vector.shape_cast %3 : vector<1x64xf32> to vector<1x1x64xf32>
    %25 = vector.broadcast %23 : vector<2x1x64xf32> to vector<2x8x64xf32>
    %26 = arith.mulf %12, %25 : vector<2x8x64xf32>
    %27 = vector.broadcast %24 : vector<1x1x64xf32> to vector<2x8x64xf32>
    %28 = arith.addf %26, %27 : vector<2x8x64xf32>
    %cst_12 = arith.constant 0.000000e+00 : f32
    %29 = vector.broadcast %cst_12 : f32 to vector<2x8x64xf32>
    %30 = arith.maximumf %28, %29 : vector<2x8x64xf32>
    %31 = vector.shape_cast %30 : vector<2x8x64xf32> to vector<16x64xf32>
    %c2 = arith.constant 2 : index
    %c0_13 = arith.constant 0 : index
    %32 = vector.load %arg4[%c2, %c0_13] : memref<56x128xf32, #tpu.memory_space<vmem>>, vector<1x48xf32>
    %c3 = arith.constant 3 : index
    %c0_14 = arith.constant 0 : index
    %33 = vector.load %arg4[%c3, %c0_14] : memref<56x128xf32, #tpu.memory_space<vmem>>, vector<1x48xf32>
    %c0_15 = arith.constant 0 : index
    %c0_16 = arith.constant 0 : index
    %34 = vector.load %arg3[%c0_15, %c0_16] : memref<64x48xf32, #tpu.memory_space<vmem>>, vector<64x48xf32>
    %cst_17 = arith.constant dense<0.000000e+00> : vector<16x48xf32>
    %35 = tpu.matmul %31, %34, %cst_17 {dimension_numbers = #tpu.dot_dimension_numbers<[1], [0], [0], [1], [0, 0, 1, 1], [], []>} : vector<16x64xf32>, vector<64x48xf32>, vector<16x48xf32> -> vector<16x48xf32>
    %36 = vector.shape_cast %35 : vector<16x48xf32> to vector<2x8x48xf32>
    %cst_18 = arith.constant dense<0.000000e+00> : vector<2x48xf32>
    %37 = vector.multi_reduction <add>, %36, %cst_18 [1] : vector<2x8x48xf32> to vector<2x48xf32>
    %38 = vector.shape_cast %37 : vector<2x48xf32> to vector<2x1x48xf32>
    %cst_19 = arith.constant 8.000000e+00 : f32
    %39 = vector.broadcast %cst_19 : f32 to vector<2x1x48xf32>
    %40 = arith.divf %38, %39 : vector<2x1x48xf32>
    %41 = vector.broadcast %40 : vector<2x1x48xf32> to vector<2x8x48xf32>
    %42 = arith.subf %36, %41 : vector<2x8x48xf32>
    %43 = arith.mulf %42, %42 : vector<2x8x48xf32>
    %cst_20 = arith.constant dense<0.000000e+00> : vector<2x48xf32>
    %44 = vector.multi_reduction <add>, %43, %cst_20 [1] : vector<2x8x48xf32> to vector<2x48xf32>
    %45 = vector.shape_cast %44 : vector<2x48xf32> to vector<2x1x48xf32>
    %cst_21 = arith.constant 8.000000e+00 : f32
    %46 = vector.broadcast %cst_21 : f32 to vector<2x1x48xf32>
    %47 = arith.divf %45, %46 : vector<2x1x48xf32>
    %48 = vector.shape_cast %32 : vector<1x48xf32> to vector<1x1x48xf32>
    %cst_22 = arith.constant 9.99999974E-5 : f32
    %49 = vector.broadcast %cst_22 : f32 to vector<2x1x48xf32>
    %50 = arith.addf %47, %49 : vector<2x1x48xf32>
    %51 = math.rsqrt %50 : vector<2x1x48xf32>
    %52 = vector.broadcast %48 : vector<1x1x48xf32> to vector<2x1x48xf32>
    %53 = arith.mulf %52, %51 : vector<2x1x48xf32>
    %54 = vector.shape_cast %33 : vector<1x48xf32> to vector<1x1x48xf32>
    %55 = vector.broadcast %53 : vector<2x1x48xf32> to vector<2x8x48xf32>
    %56 = arith.mulf %42, %55 : vector<2x8x48xf32>
    %57 = vector.broadcast %54 : vector<1x1x48xf32> to vector<2x8x48xf32>
    %58 = arith.addf %56, %57 : vector<2x8x48xf32>
    %cst_23 = arith.constant 0.000000e+00 : f32
    %59 = vector.broadcast %cst_23 : f32 to vector<2x8x48xf32>
    %60 = arith.maximumf %58, %59 : vector<2x8x48xf32>
    %61 = vector.shape_cast %60 : vector<2x8x48xf32> to vector<16x48xf32>
    %c8 = arith.constant 8 : index
    %c0_24 = arith.constant 0 : index
    %62 = vector.load %arg4[%c8, %c0_24] : memref<56x128xf32, #tpu.memory_space<vmem>>, vector<48x128xf32>
    %c4 = arith.constant 4 : index
    %c0_25 = arith.constant 0 : index
    %63 = vector.load %arg4[%c4, %c0_25] : memref<56x128xf32, #tpu.memory_space<vmem>>, vector<1x128xf32>
    %c5 = arith.constant 5 : index
    %c0_26 = arith.constant 0 : index
    %64 = vector.load %arg4[%c5, %c0_26] : memref<56x128xf32, #tpu.memory_space<vmem>>, vector<1x128xf32>
    %cst_27 = arith.constant dense<0.000000e+00> : vector<16x128xf32>
    %65 = tpu.matmul %61, %62, %cst_27 {dimension_numbers = #tpu.dot_dimension_numbers<[1], [0], [0], [1], [0, 0, 1, 1], [], []>} : vector<16x48xf32>, vector<48x128xf32>, vector<16x128xf32> -> vector<16x128xf32>
    %66 = vector.broadcast %63 : vector<1x128xf32> to vector<16x128xf32>
    %67 = arith.addf %65, %66 : vector<16x128xf32>
    %68 = arith.negf %67 : vector<16x128xf32>
    %69 = math.exp %68 : vector<16x128xf32>
    %cst_28 = arith.constant 1.000000e+00 : f32
    %70 = vector.broadcast %cst_28 : f32 to vector<16x128xf32>
    %71 = arith.addf %70, %69 : vector<16x128xf32>
    %72 = arith.divf %70, %71 : vector<16x128xf32>
    %73 = arith.subf %67, %72 : vector<16x128xf32>
    %74 = vector.broadcast %64 : vector<1x128xf32> to vector<16x128xf32>
    %75 = arith.mulf %74, %73 : vector<16x128xf32>
    %76 = arith.addf %72, %75 : vector<16x128xf32>
    %77 = vector.shape_cast %76 : vector<16x128xf32> to vector<2x8x128xf32>
    %c0_29 = arith.constant 0 : index
    %c0_30 = arith.constant 0 : index
    %c0_31 = arith.constant 0 : index
    %78 = vector.load %arg5[%c0_29, %c0_30, %c0_31] : memref<2x8x128xf32, #tpu.memory_space<vmem>>, vector<2x8x128xf32>
    tpu.vector_store %arg5[%c0_29, %c0_30, %c0_31], %77 {strides = array<i32>} : memref<2x8x128xf32, #tpu.memory_space<vmem>>, vector<2x8x128xf32>,
    return
  }
  func.func @transform_0(%arg0: i32) -> (i32, i32, i32) {
    %c0_i32 = arith.constant 0 : i32
    %c0_i32_0 = arith.constant 0 : i32
    %c0_i32_1 = arith.constant 0 : i32
    return %arg0, %c0_i32, %c0_i32_0 : i32, i32, i32
  }
  func.func @transform_1(%arg0: i32) -> (i32, i32) {
    %c0_i32 = arith.constant 0 : i32
    %c0_i32_0 = arith.constant 0 : i32
    %c0_i32_1 = arith.constant 0 : i32
    return %c0_i32, %c0_i32_0 : i32, i32
  }
  func.func @transform_2(%arg0: i32) -> (i32, i32) {
    %c0_i32 = arith.constant 0 : i32
    %c0_i32_0 = arith.constant 0 : i32
    %c0_i32_1 = arith.constant 0 : i32
    return %c0_i32, %c0_i32_0 : i32, i32
  }
  func.func @transform_3(%arg0: i32) -> (i32, i32) {
    %c0_i32 = arith.constant 0 : i32
    %c0_i32_0 = arith.constant 0 : i32
    %c0_i32_1 = arith.constant 0 : i32
    return %c0_i32, %c0_i32_0 : i32, i32
  }
  func.func @transform_4(%arg0: i32) -> (i32, i32, i32) {
    %c0_i32 = arith.constant 0 : i32
    %c0_i32_0 = arith.constant 0 : i32
    %c0_i32_1 = arith.constant 0 : i32
    return %arg0, %c0_i32, %c0_i32_0 : i32, i32, i32
  }
}

module attributes {stable_mosaic.version = 11 : i64} {
  func.func @_ladder_fc_kernel(%arg0: i32, %arg1: memref<2x8x32xf32, #tpu.memory_space<vmem>>, %arg2: memref<32x64xf32, #tpu.memory_space<vmem>>, %arg3: memref<64x48xf32, #tpu.memory_space<vmem>>, %arg4: memref<56x128xf32, #tpu.memory_space<vmem>>, %arg5: memref<2x8x128xf32, #tpu.memory_space<vmem>>) attributes {dimension_semantics = [#tpu.dimension_semantics<parallel>], iteration_bounds = array<i64: 2>, scalar_prefetch = 0 : i64, scratch_operands = 0 : i64, tpu.core_type = #tpu.core_type<tc>, window_params = [{transform_indices = @transform_0, window_bounds = array<i64: 2, 8, 32>}, {pipeline_mode = #tpu.pipeline_mode<synchronous>, transform_indices = @transform_1, window_bounds = array<i64: 32, 64>}, {pipeline_mode = #tpu.pipeline_mode<synchronous>, transform_indices = @transform_2, window_bounds = array<i64: 64, 48>}, {pipeline_mode = #tpu.pipeline_mode<synchronous>, transform_indices = @transform_3, window_bounds = array<i64: 56, 128>}, {transform_indices = @transform_4, window_bounds = array<i64: 2, 8, 128>}]} {
    %c0 = arith.constant 0 : index
    %c0_0 = arith.constant 0 : index
    %c0_1 = arith.constant 0 : index
    %0 = vector.load %arg1[%c0, %c0_0, %c0_1] : memref<2x8x32xf32, #tpu.memory_space<vmem>>, vector<2x8x32xf32>
    %1 = vector.shape_cast %0 : vector<2x8x32xf32> to vector<16x32xf32>
    %c0_2 = arith.constant 0 : index
    %c0_3 = arith.constant 0 : index
    %2 = vector.load %arg4[%c0_2, %c0_3] : memref<56x128xf32, #tpu.memory_space<vmem>>, vector<1x64xf32>
    %c1 = arith.constant 1 : index
    %c0_4 = arith.constant 0 : index
    %3 = vector.load %arg4[%c1, %c0_4] : memref<56x128xf32, #tpu.memory_space<vmem>>, vector<1x64xf32>
    %c0_5 = arith.constant 0 : index
    %c0_6 = arith.constant 0 : index
    %4 = vector.load %arg2[%c0_5, %c0_6] : memref<32x64xf32, #tpu.memory_space<vmem>>, vector<32x64xf32>
    %cst = arith.constant dense<0.000000e+00> : vector<16x64xf32>
    %5 = tpu.matmul %1, %4, %cst {dimension_numbers = #tpu.dot_dimension_numbers<[1], [0], [0], [1], [0, 0, 1, 1], [], []>} : vector<16x32xf32>, vector<32x64xf32>, vector<16x64xf32> -> vector<16x64xf32>
    %6 = vector.shape_cast %5 : vector<16x64xf32> to vector<2x8x64xf32>
    %cst_7 = arith.constant dense<0.000000e+00> : vector<2x64xf32>
    %7 = vector.multi_reduction <add>, %6, %cst_7 [1] : vector<2x8x64xf32> to vector<2x64xf32>
    %8 = vector.shape_cast %7 : vector<2x64xf32> to vector<2x1x64xf32>
    %cst_8 = arith.constant 8.000000e+00 : f32
    %9 = vector.broadcast %cst_8 : f32 to vector<2x1x64xf32>
    %10 = arith.divf %8, %9 : vector<2x1x64xf32>
    %11 = vector.broadcast %10 : vector<2x1x64xf32> to vector<2x8x64xf32>
    %12 = arith.subf %6, %11 : vector<2x8x64xf32>
    %13 = arith.mulf %12, %12 : vector<2x8x64xf32>
    %cst_9 = arith.constant dense<0.000000e+00> : vector<2x64xf32>
    %14 = vector.multi_reduction <add>, %13, %cst_9 [1] : vector<2x8x64xf32> to vector<2x64xf32>
    %15 = vector.shape_cast %14 : vector<2x64xf32> to vector<2x1x64xf32>
    %cst_10 = arith.constant 8.000000e+00 : f32
    %16 = vector.broadcast %cst_10 : f32 to vector<2x1x64xf32>
    %17 = arith.divf %15, %16 : vector<2x1x64xf32>
    %18 = vector.shape_cast %2 : vector<1x64xf32> to vector<1x1x64xf32>
    %cst_11 = arith.constant 9.99999974E-5 : f32
    %19 = vector.broadcast %cst_11 : f32 to vector<2x1x64xf32>
    %20 = arith.addf %17, %19 : vector<2x1x64xf32>
    %21 = math.rsqrt %20 : vector<2x1x64xf32>
    %22 = vector.broadcast %18 : vector<1x1x64xf32> to vector<2x1x64xf32>
    %23 = arith.mulf %22, %21 : vector<2x1x64xf32>
    %24 = vector.shape_cast %3 : vector<1x64xf32> to vector<1x1x64xf32>
    %25 = vector.broadcast %23 : vector<2x1x64xf32> to vector<2x8x64xf32>
    %26 = arith.mulf %12, %25 : vector<2x8x64xf32>
    %27 = vector.broadcast %24 : vector<1x1x64xf32> to vector<2x8x64xf32>
    %28 = arith.addf %26, %27 : vector<2x8x64xf32>
    %cst_12 = arith.constant 0.000000e+00 : f32
    %29 = vector.broadcast %cst_12 : f32 to vector<2x8x64xf32>
    %30 = arith.maximumf %28, %29 : vector<2x8x64xf32>
    %31 = vector.shape_cast %30 : vector<2x8x64xf32> to vector<16x64xf32>
    %c2 = arith.constant 2 : index
    %c0_13 = arith.constant 0 : index
    %32 = vector.load %arg4[%c2, %c0_13] : memref<56x128xf32, #tpu.memory_space<vmem>>, vector<1x48xf32>
    %c3 = arith.constant 3 : index
    %c0_14 = arith.constant 0 : index
    %33 = vector.load %arg4[%c3, %c0_14] : memref<56x128xf32, #tpu.memory_space<vmem>>, vector<1x48xf32>
    %c0_15 = arith.constant 0 : index
    %c0_16 = arith.constant 0 : index
    %34 = vector.load %arg3[%c0_15, %c0_16] : memref<64x48xf32, #tpu.memory_space<vmem>>, vector<64x48xf32>
    %cst_17 = arith.constant dense<0.000000e+00> : vector<16x48xf32>
    %35 = tpu.matmul %31, %34, %cst_17 {dimension_numbers = #tpu.dot_dimension_numbers<[1], [0], [0], [1], [0, 0, 1, 1], [], []>} : vector<16x64xf32>, vector<64x48xf32>, vector<16x48xf32> -> vector<16x48xf32>
    %36 = vector.shape_cast %35 : vector<16x48xf32> to vector<2x8x48xf32>
    %cst_18 = arith.constant dense<0.000000e+00> : vector<2x48xf32>
    %37 = vector.multi_reduction <add>, %36, %cst_18 [1] : vector<2x8x48xf32> to vector<2x48xf32>
    %38 = vector.shape_cast %37 : vector<2x48xf32> to vector<2x1x48xf32>
    %cst_19 = arith.constant 8.000000e+00 : f32
    %39 = vector.broadcast %cst_19 : f32 to vector<2x1x48xf32>
    %40 = arith.divf %38, %39 : vector<2x1x48xf32>
    %41 = vector.broadcast %40 : vector<2x1x48xf32> to vector<2x8x48xf32>
    %42 = arith.subf %36, %41 : vector<2x8x48xf32>
    %43 = arith.mulf %42, %42 : vector<2x8x48xf32>
    %cst_20 = arith.constant dense<0.000000e+00> : vector<2x48xf32>
    %44 = vector.multi_reduction <add>, %43, %cst_20 [1] : vector<2x8x48xf32> to vector<2x48xf32>
    %45 = vector.shape_cast %44 : vector<2x48xf32> to vector<2x1x48xf32>
    %cst_21 = arith.constant 8.000000e+00 : f32
    %46 = vector.broadcast %cst_21 : f32 to vector<2x1x48xf32>
    %47 = arith.divf %45, %46 : vector<2x1x48xf32>
    %48 = vector.shape_cast %32 : vector<1x48xf32> to vector<1x1x48xf32>
    %cst_22 = arith.constant 9.99999974E-5 : f32
    %49 = vector.broadcast %cst_22 : f32 to vector<2x1x48xf32>
    %50 = arith.addf %47, %49 : vector<2x1x48xf32>
    %51 = math.rsqrt %50 : vector<2x1x48xf32>
    %52 = vector.broadcast %48 : vector<1x1x48xf32> to vector<2x1x48xf32>
    %53 = arith.mulf %52, %51 : vector<2x1x48xf32>
    %54 = vector.shape_cast %33 : vector<1x48xf32> to vector<1x1x48xf32>
    %55 = vector.broadcast %53 : vector<2x1x48xf32> to vector<2x8x48xf32>
    %56 = arith.mulf %42, %55 : vector<2x8x48xf32>
    %57 = vector.broadcast %54 : vector<1x1x48xf32> to vector<2x8x48xf32>
    %58 = arith.addf %56, %57 : vector<2x8x48xf32>
    %cst_23 = arith.constant 0.000000e+00 : f32
    %59 = vector.broadcast %cst_23 : f32 to vector<2x8x48xf32>
    %60 = arith.maximumf %58, %59 : vector<2x8x48xf32>
    %61 = vector.shape_cast %60 : vector<2x8x48xf32> to vector<16x48xf32>
    %c8 = arith.constant 8 : index
    %c0_24 = arith.constant 0 : index
    %62 = vector.load %arg4[%c8, %c0_24] : memref<56x128xf32, #tpu.memory_space<vmem>>, vector<48x128xf32>
    %c4 = arith.constant 4 : index
    %c0_25 = arith.constant 0 : index
    %63 = vector.load %arg4[%c4, %c0_25] : memref<56x128xf32, #tpu.memory_space<vmem>>, vector<1x128xf32>
    %c5 = arith.constant 5 : index
    %c0_26 = arith.constant 0 : index
    %64 = vector.load %arg4[%c5, %c0_26] : memref<56x128xf32, #tpu.memory_space<vmem>>, vector<1x128xf32>
    %cst_27 = arith.constant dense<0.000000e+00> : vector<16x128xf32>
    %65 = tpu.matmul %61, %62, %cst_27 {dimension_numbers = #tpu.dot_dimension_numbers<[1], [0], [0], [1], [0, 0, 1, 1], [], []>} : vector<16x48xf32>, vector<48x128xf32>, vector<16x128xf32> -> vector<16x128xf32>
    %66 = vector.broadcast %63 : vector<1x128xf32> to vector<16x128xf32>
    %67 = arith.addf %65, %66 : vector<16x128xf32>
    %68 = arith.negf %67 : vector<16x128xf32>
    %69 = math.exp %68 : vector<16x128xf32>
    %cst_28 = arith.constant 1.000000e+00 : f32
    %70 = vector.broadcast %cst_28 : f32 to vector<16x128xf32>
    %71 = arith.addf %70, %69 : vector<16x128xf32>
    %72 = arith.divf %70, %71 : vector<16x128xf32>
    %73 = arith.subf %67, %72 : vector<16x128xf32>
    %74 = vector.broadcast %64 : vector<1x128xf32> to vector<16x128xf32>
    %75 = arith.mulf %74, %73 : vector<16x128xf32>
    %76 = arith.addf %72, %75 : vector<16x128xf32>
    %77 = vector.shape_cast %76 : vector<16x128xf32> to vector<2x8x128xf32>
    %c0_29 = arith.constant 0 : index
    %c0_30 = arith.constant 0 : index
    %c0_31 = arith.constant 0 : index
    %78 = vector.load %arg5[%c0_29, %c0_30, %c0_31] : memref<2x8x128xf32, #tpu.memory_space<vmem>>, vector<2x8x128xf32>
    tpu.vector_store %arg5[%c0_29, %c0_30, %c0_31], %77 {strides = array<i32>} : memref<2x8x128xf32, #tpu.memory_space<vmem>>, vector<2x8x128xf32>,
    return
  }
  func.func @transform_0(%arg0: i32) -> (i32, i32, i32) {
    %c0_i32 = arith.constant 0 : i32
    %c0_i32_0 = arith.constant 0 : i32
    %c0_i32_1 = arith.constant 0 : i32
    return %arg0, %c0_i32, %c0_i32_0 : i32, i32, i32
  }
  func.func @transform_1(%arg0: i32) -> (i32, i32) {
    %c0_i32 = arith.constant 0 : i32
    %c0_i32_0 = arith.constant 0 : i32
    %c0_i32_1 = arith.constant 0 : i32
    return %c0_i32, %c0_i32_0 : i32, i32
  }
  func.func @transform_2(%arg0: i32) -> (i32, i32) {
    %c0_i32 = arith.constant 0 : i32
    %c0_i32_0 = arith.constant 0 : i32
    %c0_i32_1 = arith.constant 0 : i32
    return %c0_i32, %c0_i32_0 : i32, i32
  }
  func.func @transform_3(%arg0: i32) -> (i32, i32) {
    %c0_i32 = arith.constant 0 : i32
    %c0_i32_0 = arith.constant 0 : i32
    %c0_i32_1 = arith.constant 0 : i32
    return %c0_i32, %c0_i32_0 : i32, i32
  }
  func.func @transform_4(%arg0: i32) -> (i32, i32, i32) {
    %c0_i32 = arith.constant 0 : i32
    %c0_i32_0 = arith.constant 0 : i32
    %c0_i32_1 = arith.constant 0 : i32
    return %arg0, %c0_i32, %c0_i32_0 : i32, i32, i32
  }
}

</mosaic_0001>

<bundles_post_ra>
// kernel: tpu_custom_call.1
= control target key start
LH: loop header
LB: loop body
LE: loop exit
PB: predicated region body
PF: predicated region fallthrough
CT: control target
= control target key end

     0   :  { %9 = vsyncpa [#allocation3], 0  ;;  %s1267_s0 = inlined_call_operand.vmem [shape: f32[4,8,32], index: 0, kind: input, shape index: {}]   ;;  %s1268_s1 = inlined_call_operand.hbm [shape: f32[32,64], index: 1, kind: input, shape index: {}]   ;;  %s1269_s2 = inlined_call_operand.vmem [shape: f32[64,48], index: 2, kind: input, shape index: {}]   ;;  %s1270_s3 = inlined_call_operand.vmem [shape: f32[56,128], index: 3, kind: input, shape index: {}]   ;;  %s1271_s4 = inlined_call_operand.hbm [shape: f32[4,8,128], index: 4, kind: output, shape index: {}]  }
   0x1   :  { %10 = vsyncpa [#allocation4], 0 }
   0x2   :  { %12 = vsyncpa [#allocation4 + $0x1], 0  ;;  %s1052_s15 = smov 0   ;;  %s1054_s16 = smov 0  }
   0x3   :  { %s1056_s17 = smov 0   ;;  %s1058_s18 = smov 0  }
   0x4 LB: > { %s1073_s19 = sadd.s32 4294967295, %s1019_s18   ;;  %s723_s20 = sadd.s32 4294967294, %s1019_s18   ;;  %s1019_s18 = sphi %s1058_s18, %s1287_s18   ;;  %s1015_s17 = sphi %s1056_s17, %s1286_s17   ;;  %s1011_s16 = sphi %s1054_s16, %s1285_s16   ;;  %s1007_s15 = sphi %s1052_s15, %s1284_s15  }
   0x5   : > { %s1077_s21 = sadd.s32 1, %s1019_s18   ;;  %s114_s22 = sadd.s32 1, %s1015_s17 }
   0x6   : > { %s111_s23 = ssub.s32 %s1019_s18, %s1077_s21  ;;  %p124_p0 = scmp.ne.s32.totalorder %s1015_s17, %s1011_s16 }
   0x7   : > { %p112_p1 = scmp.eq.s32.totalorder %s111_s23, 0  ;;  %p125_p2 = scmp.eq.s32.totalorder %s1073_s19, 1 }
   0x8   : > { %p130_p3 = scmp.ne.s32.totalorder %s1011_s16, %s1007_s15  ;;  %p131_p4 = scmp.eq.s32.totalorder %s723_s20, 1 }
   0x9   : > { %s1088_s24 = scalar_select %p112_p1, %s1015_s17, %s114_s22  }
   0xa   : > { %p1090_p5 = por %p125_p2, %p124_p0  ;;  %p1094_p6 = por %p131_p4, %p130_p3 }
   0xb   : > { %p724_p7 = scmp.ge.s32.totalorder %s1019_s18, 1  ;;  %p138_p8 = scmp.lt.s32.totalorder %s1019_s18, 3 }
   0xc   : > { %s1275_s25 = scalar_select %p1090_p5, 1, 0 }
   0xd   : > { %s1276_s26 = scalar_select %p1094_p6, 1, 0 }
   0xe   : > { %p1272_p9 = scmp.eq.s32.totalorder %s1073_s19, 0  ;;  %p1101_p10 = pnand %p724_p7, %p138_p8 }
   0xf   : > { %s1021_s28 = smov [#allocation2]   ;;  %s925_s7 = scalar_lea.hbm %s1268_s1, 512 }
  0x10   : > { %s1277_s27 = scalar_select %p1101_p10, 1, 0 }
  0x11   : > { %s150_s29 = sshll.u32 %s1021_s28, 4  ;;  %p861_p11 = pneg %p1101_p10  ;;  %s151_s29 = int_to_ptr.vmem [resolvable:$true] %s150_s29 }
  0x12   : > { %p926_p13 = scmp.ne.s32.totalorder %s1268_s1, %s925_s7  ;;  %p932_p3 = scmp.lt.u32.totalorder %s925_s7, %s1268_s1 }
  0x13   : > { %p1109_p12 = pnand %p1272_p9, %p861_p11 }
  0x15   : > { %p927_p0 = pneg %p1109_p12 }
  0x17   : > { %p928_p1 = pnand %p927_p0, %p926_p13 }
  0x19   : > { %p929_p2 = pneg %p928_p1 }
  0x1b   : > { %p934_p4 = pnand %p932_p3, %p929_p2 }
  0x1d   : > { %937 = shalt.err (!%p934_p4)
}
  0x1e   : > { %s938_s12 = scalar_lea.vmem %s151_s29, 512  ;;  %p946_p9 = scmp.lt.s32.totalorder %s151_s29, %s151_s29 }
  0x1f   : > { %p939_p7 = scmp.ne.s32.totalorder %s151_s29, %s938_s12  ;;  %p947_p6 = scmp.lt.s32.totalorder %s938_s12, %s938_s12 }
  0x21   : > { %p941_p8 = pnand %p939_p7, %p927_p0  ;;  %p948_p5 = por %p947_p6, %p946_p9 }
  0x23   : > { %p942_p11 = pneg %p941_p8 }
  0x25   : > { %p949_p10 = pnand %p948_p5, %p942_p11 }
  0x27   : > { %952 = shalt.err (!%p949_p10)
}
  0x28   : > { %s1022_s13 = smov 128   ;;  %s1023_s14 = smov 8  }
  0x29   : > { %864 = dma.hbm_to_vmem [thread:$0]  (!%p1109_p12), %s1268_s1, 512, %s151_s29, [#allocation3], %s1022_s13, %s1022_s13, %s1023_s14  }
  0x2a   : > { %p1279_p13 = scmp.ne.s32.totalorder %s1277_s27, 0 }
  0x2b   : > { %p1280_p1 = scmp.eq.s32.totalorder (!%p1279_p13), %s1073_s19, 0 }
  0x2c   : > { %181 = sbr.rel (%p1279_p13) target bundleno = 867 (0x363), region = 36 }
  0x33   : > { %998 = dma.done.wait (%p1280_p1), [#allocation3], 512   ;;  %p1281_p0 = pmov %p1280_p1 }
  0x34   : > { %s730_s23 = sshll.u32 %s1073_s19, 1  ;;  %vm222_vm0 = vcmask 261120   ;;  %v218_v0 = vld [vmem:[#allocation2] sm:$0xff]  ;;  %v219_v1 = vld [vmem:[#allocation2 + $0x8] sm:$0xff]  ;;  %v220_v2 = vld [vmem:[#allocation2 + $0x10] sm:$0xff]  ;;  %vm304_vm1 = vcmask 523264   ;;  %v348_v60 = vlaneseq }
  0x35   : > { %1000 = vsyncadd (%p1281_p0), [#allocation3], 4294966784  ;;  %p208_p5 = scmp.lt.s32.totalorder %s730_s23, 3  ;;  %v819_v3 = vpack.c.bf16 %v219_v1, %v218_v0  ;;  %v221_v4 = vld [vmem:[#allocation2 + $0x18] sm:$0xff]  ;;  %v368_v8 = vld [vmem:[%s1269_s2] sm:$0xff]  ;;  %vm457_vm2 = vcmask 392192  }
  0x36   : > { %v823_v6 = vpack.c.bf16 %v221_v4, %v220_v2  ;;  %v369_v9 = vld [vmem:[%s1269_s2 + $0x8] sm:$0xff]  ;;  %v370_v11 = vld [vmem:[%s1269_s2 + $0x10] sm:$0xff]  ;;  %v371_v12 = vld [vmem:[%s1269_s2 + $0x18] sm:$0xff]  ;;  %v349_v61 = vshrl.u32 %v348_v60, 7  ;;  %s204_s9 = sand.u32 1, %s1011_s16   ;;  %s749_s20 = sshll.u32 %s1073_s19, 8 }
  0x37   : > { %s1289_s23 = smov (!%p208_p5, %s730_s23), 3  ;;  %820 = vmatprep.subr.bf16.mxu0 %v819_v3  ;;  %v827_v10 = vpack.c.bf16 %v369_v9, %v368_v8  ;;  %v831_v13 = vpack.c.bf16 %v371_v12, %v370_v11  ;;  %v372_v14 = vld [vmem:[%s1269_s2 + $0x20] sm:$0xff]  ;;  %v373_v15 = vld [vmem:[%s1269_s2 + $0x28] sm:$0xff]  ;;  %v374_v17 = vld [vmem:[%s1269_s2 + $0x30] sm:$0xff]  ;;  %s729_s10 = sshll.u32 %s204_s9, 4 }
  0x38   : > { %s731_s28 = sshll.u32 %s1289_s23, 3  ;;  %822 = vmatpush3.bf16.msra.mxu0 %v819_v3  ;;  %v835_v16 = vpack.c.bf16 %v373_v15, %v372_v14  ;;  %v375_v18 = vld [vmem:[%s1269_s2 + $0x38] sm:$0xff]  ;;  %v216_v62 = vld [vmem:[%s1270_s3] sm:$0x1]  ;;  %v1170_v63 = vsub.s32 0, %v349_v61  ;;  %v519_v14 = vld [vmem:[%s1270_s3 + $0x10] sm:$0xff] }
  0x39   : > { %s211_s6 = scalar_lea.vmem %s1267_s0, %s731_s28  ;;  %824 = vmatprep.subr.bf16.mxu0 %v823_v6  ;;  %828 = vmatprep.subr.bf16.mxu1 %v827_v10  ;;  %v839_v19 = vpack.c.bf16 %v375_v18, %v374_v17  ;;  %v521_v17 = vld [vmem:[%s1270_s3 + $0x20] sm:$0xff]  ;;  %s206_s13 = scalar_lea.vmem [#allocation5], %s729_s10 }
  0x3a   : > { %v214_v5 = vld [vmem:[%s211_s6] sm:$0xff]  ;;  %v215_v7 = vld [vmem:[%s211_s6 + $0x8] sm:$0xff]  ;;  %830 = vmatpush3.bf16.msra.mxu1 %v827_v10  ;;  %s649_s14 = sshll.u32 %s206_s13, 4  ;;  %s1222_s28 = scalar_lea.hbm %s1271_s4, %s749_s20  ;;  %s1224_s14 = int_to_ptr.vmem [resolvable:$true] %s649_s14 }
  0x3b   : > { %782 = vmatprep.mubr.msk.f32.mxu0 %vm222_vm0, %v214_v5  ;;  %832 = vmatprep.subr.bf16.mxu1 %v831_v13  ;;  %s1226_s5 = scalar_lea.sflag [#allocation4], %s204_s9  ;;  %s953_s30 = scalar_lea.vmem %s1224_s14, 256 }
  0x3c   : > { %826 = vmatpush3.bf16.msra.mxu0 %v823_v6  ;;  %v734_v6 = vld [vmem:[%s1270_s3 + $0x1] ss:$0 sm:$0xff]  ;;  %p954_p6 = scmp.ne.s32.totalorder %s1224_s14, %s953_s30  ;;  %p1282_p9 = scmp.ne.s32.totalorder %s1275_s25, 0 }
  0x3d   : > { %s1024_s19 = smov [#allocation5]  }
  0x3e   : > { %834 = vmatpush3.bf16.msra.mxu1 %v831_v13  ;;  %v518_v13 = vld [vmem:[%s1270_s3 + $0x8] sm:$0xff]  ;;  %p955_p10 = pnand %p954_p6, %p1282_p9  ;;  %s957_s6 = sshll.u32 %s1024_s19, 4  ;;  %s958_s6 = int_to_ptr.vmem [resolvable:$false] %s957_s6 }
  0x3f   : > { %783 = vmatmul.mubr.msk.f32.vlgmr.msra.gmra.mrb[0].mxu0 %vm222_vm0, %v215_v7  ;;  %836 = vmatprep.subr.bf16.mxu1 %v835_v16  ;;  %v843_v15 = vpack.c.bf16 %v519_v14, %v518_v13  ;;  %v738_v13 = vld [vmem:[%s1270_s3 + $0x4] ss:$0 sm:$0xff]  ;;  %s959_s27 = scalar_lea.vmem %s958_s6, 512  ;;  %p960_p2 = scmp.lt.s32.totalorder %s1224_s14, %s958_s6 }
  0x40   : > { %p956_p12 = pneg %p955_p10  ;;  %p961_p3 = scmp.lt.s32.totalorder %s959_s27, %s953_s30 }
  0x41   : > { %844 = vmatprep.subr.bf16.mxu0 %v843_v15 }
  0x42   : > { %838 = vmatpush3.bf16.msra.mxu1 %v835_v16  ;;  %846 = vmatpush3.bf16.msra.mxu0 %v843_v15  ;;  %v520_v16 = vld [vmem:[%s1270_s3 + $0x18] sm:$0xff]  ;;  %p962_p4 = por %p961_p3, %p960_p2 }
  0x43   : > { %840 = vmatprep.subr.bf16.mxu1 %v839_v19  ;;  %v847_v18 = vpack.c.bf16 %v521_v17, %v520_v16 }
  0x44   : > { %p963_p7 = pnand %p962_p4, %p956_p12 }
  0x45   : > { %848 = vmatprep.subr.bf16.mxu0 %v847_v18 }
  0x46   : > { %842 = vmatpush3.bf16.msra.mxu1 %v839_v19  ;;  %850 = vmatpush3.bf16.msra.mxu0 %v847_v18  ;;  %v522_v19 = vld [vmem:[%s1270_s3 + $0x28] sm:$0xff] }
 0x112   : > { %v784_v20 = vpop.f32.mrb[0].mxu0 }
 0x113   : > { %v312_v21 = vsel %vm304_vm1, %v784_v20, 0.0  ;;  %v295_v22 = vpop.f32.mrb[1].mxu0 }
 0x114   : > { %v313_v23 = vrot.slane %v312_v21, 4  ;;  %v305_v24 = vsel %vm304_vm1, %v295_v22, 0.0 }
 0x115   : > { %v306_v25 = vrot.slane %v305_v24, 4 }
 0x116   : > { %v314_v26 = vadd.f32 %v313_v23, %v312_v21 }
 0x117   : > { %v307_v27 = vadd.f32 %v306_v25, %v305_v24 }
 0x118   : > { %v315_v28 = vrot.slane %v314_v26, 2 }
 0x119   : > { %v308_v29 = vrot.slane %v307_v27, 2 }
 0x11a   : > { %v316_v30 = vadd.f32 %v315_v28, %v314_v26 }
 0x11b   : > { %v309_v31 = vadd.f32 %v308_v29, %v307_v27 }
 0x11c   : > { %v317_v32 = vrot.slane %v316_v30, 1 }
 0x11d   : > { %v310_v33 = vrot.slane %v309_v31, 1 }
 0x11e   : > { %v318_v34 = vadd.f32 %v317_v32, %v316_v30 }
 0x11f   : > { %v311_v35 = vadd.f32 %v310_v33, %v309_v31 }
 0x120   : > { %v321_v36 = vmul.f32 0.125, %v318_v34 }
 0x121   : > { %v320_v37 = vmul.f32 0.125, %v311_v35 }
 0x122   : > { %v323_v38 = vsub.f32 %v784_v20, %v321_v36  ;;  %v523_v20 = vld [vmem:[%s1270_s3 + $0x30] sm:$0xff] }
 0x123   : > { %v322_v39 = vsub.f32 %v295_v22, %v320_v37  ;;  %v851_v21 = vpack.c.bf16 %v523_v20, %v522_v19 }
 0x124   : > { %v325_v40 = vmul.f32 %v323_v38, %v323_v38 }
 0x125   : > { %v324_v41 = vmul.f32 %v322_v39, %v322_v39  ;;  %852 = vmatprep.subr.bf16.mxu0 %v851_v21 }
 0x126   : > { %v333_v42 = vsel %vm304_vm1, %v325_v40, 0.0  ;;  %854 = vmatpush3.bf16.msra.mxu0 %v851_v21 }
 0x127   : > { %v334_v43 = vrot.slane %v333_v42, 4  ;;  %v326_v44 = vsel %vm304_vm1, %v324_v41, 0.0 }
 0x128   : > { %v327_v45 = vrot.slane %v326_v44, 4 }
 0x129   : > { %v335_v46 = vadd.f32 %v334_v43, %v333_v42 }
 0x12a   : > { %v328_v47 = vadd.f32 %v327_v45, %v326_v44 }
 0x12b   : > { %v336_v48 = vrot.slane %v335_v46, 2 }
 0x12c   : > { %v329_v49 = vrot.slane %v328_v47, 2 }
 0x12d   : > { %v337_v50 = vadd.f32 %v336_v48, %v335_v46 }
 0x12e   : > { %v330_v51 = vadd.f32 %v329_v49, %v328_v47 }
 0x12f   : > { %v338_v52 = vrot.slane %v337_v50, 1 }
 0x130   : > { %v331_v53 = vrot.slane %v330_v51, 1 }
 0x131   : > { %v339_v54 = vadd.f32 %v338_v52, %v337_v50 }
 0x132   : > { %v332_v55 = vadd.f32 %v331_v53, %v330_v51 }
 0x133   : > { %v341_v56 = vmul.f32 0.125, %v339_v54 }
 0x134   : > { %v340_v57 = vmul.f32 0.125, %v332_v55 }
 0x135   : > { %v343_v58 = vadd.f32 0.0001, %v341_v56 }
 0x136   : > { %v342_v59 = vadd.f32 0.0001, %v340_v57 }
 0x137   : > { %909 = vrsqrt.f32 %v343_v58 }
 0x138   : > { %911 = vrsqrt.f32 %v342_v59 }
 0x141   : > { %v910_v0 = vpop.eup %909 }
 0x142   : > { %v912_v1 = vpop.eup %911  ;;  %v347_v2 = vmul.f32 %v910_v0, %v216_v62 }
 0x143   : > { %v346_v3 = vmul.f32 %v912_v1, %v216_v62  ;;  %v366_v62 = vld [vmem:[%s1270_s3 + $0x2] sm:$0x1] }
 0x144   : > { %v355_v4 = vrot.slane %v347_v2, %v1170_v63 }
 0x145   : > { %v351_v5 = vrot.slane %v346_v3, %v1170_v63 }
 0x146   : > { %v357_v7 = vmul.f32 %v355_v4, %v323_v38 }
 0x147   : > { %v356_v8 = vmul.f32 %v351_v5, %v322_v39  ;;  %v737_v5 = vld [vmem:[%s1270_s3 + $0x3] ss:$0 sm:$0xff] }
 0x148   : > { %v363_v9 = vadd.f32 %v734_v6, %v357_v7 }
 0x149   : > { %v362_v10 = vadd.f32 %v734_v6, %v356_v8 }
 0x14a   : > { %v365_v12 = vmax.f32 %v363_v9, 0.0 }
 0x14b   : > { %v364_v11 = vmax.f32 %v362_v10, 0.0 }
 0x14d   : > { %801 = vmatprep.mubr.msk.f32.mxu1 %vm304_vm1, %v364_v11 }
 0x14e   : > { %802 = vmatmul.mubr.msk.f32.vlgmr.msra.gmra.mrb[0].mxu1 %vm304_vm1, %v365_v12 }
 0x221   : > { %v803_v22 = vpop.f32.mrb[0].mxu1 }
 0x222   : > { %v465_v23 = vsel %vm457_vm2, %v803_v22, 0.0  ;;  %v448_v24 = vpop.f32.mrb[1].mxu1 }
 0x223   : > { %v466_v25 = vrot.slane %v465_v23, 4  ;;  %v458_v26 = vsel %vm457_vm2, %v448_v24, 0.0 }
 0x224   : > { %v459_v27 = vrot.slane %v458_v26, 4 }
 0x225   : > { %v467_v28 = vadd.f32 %v466_v25, %v465_v23 }
 0x226   : > { %v460_v29 = vadd.f32 %v459_v27, %v458_v26 }
 0x227   : > { %v468_v30 = vrot.slane %v467_v28, 2 }
 0x228   : > { %v461_v31 = vrot.slane %v460_v29, 2 }
 0x229   : > { %v469_v32 = vadd.f32 %v468_v30, %v467_v28 }
 0x22a   : > { %v462_v33 = vadd.f32 %v461_v31, %v460_v29 }
 0x22b   : > { %v470_v34 = vrot.slane %v469_v32, 1 }
 0x22c   : > { %v463_v35 = vrot.slane %v462_v33, 1 }
 0x22d   : > { %v471_v36 = vadd.f32 %v470_v34, %v469_v32 }
 0x22e   : > { %v464_v37 = vadd.f32 %v463_v35, %v462_v33 }
 0x22f   : > { %v473_v38 = vmul.f32 0.125, %v471_v36 }
 0x230   : > { %v472_v39 = vmul.f32 0.125, %v464_v37 }
 0x231   : > { %v475_v40 = vsub.f32 %v803_v22, %v473_v38 }
 0x232   : > { %v474_v41 = vsub.f32 %v448_v24, %v472_v39  ;;  %v743_v24 = vld [vmem:[%s1270_s3 + $0x5] ss:$0 sm:$0xff] }
 0x233   : > { %v477_v42 = vmul.f32 %v475_v40, %v475_v40 }
 0x234   : > { %v476_v43 = vmul.f32 %v474_v41, %v474_v41 }
 0x235   : > { %v485_v44 = vsel %vm457_vm2, %v477_v42, 0.0 }
 0x236   : > { %v486_v45 = vrot.slane %v485_v44, 4  ;;  %v478_v46 = vsel %vm457_vm2, %v476_v43, 0.0 }
 0x237   : > { %v479_v47 = vrot.slane %v478_v46, 4 }
 0x238   : > { %v487_v48 = vadd.f32 %v486_v45, %v485_v44 }
 0x239   : > { %v480_v49 = vadd.f32 %v479_v47, %v478_v46 }
 0x23a   : > { %v488_v50 = vrot.slane %v487_v48, 2 }
 0x23b   : > { %v481_v51 = vrot.slane %v480_v49, 2 }
 0x23c   : > { %v489_v52 = vadd.f32 %v488_v50, %v487_v48 }
 0x23d   : > { %v482_v53 = vadd.f32 %v481_v51, %v480_v49 }
 0x23e   : > { %v490_v54 = vrot.slane %v489_v52, 1 }
 0x23f   : > { %v483_v55 = vrot.slane %v482_v53, 1 }
 0x240   : > { %v491_v56 = vadd.f32 %v490_v54, %v489_v52 }
 0x241   : > { %v484_v57 = vadd.f32 %v483_v55, %v482_v53 }
 0x242   : > { %v493_v58 = vmul.f32 0.125, %v491_v56 }
 0x243   : > { %v492_v59 = vmul.f32 0.125, %v484_v57 }
 0x244   : > { %v495_v60 = vadd.f32 0.0001, %v493_v58 }
 0x245   : > { %v494_v61 = vadd.f32 0.0001, %v492_v59 }
 0x246   : > { %913 = vrsqrt.f32 %v495_v60 }
 0x247   : > { %915 = vrsqrt.f32 %v494_v61 }
 0x250   : > { %v914_v0 = vpop.eup %913 }
 0x251   : > { %v916_v1 = vpop.eup %915  ;;  %v499_v2 = vmul.f32 %v914_v0, %v366_v62 }
 0x252   : > { %v498_v3 = vmul.f32 %v916_v1, %v366_v62 }
 0x253   : > { %v507_v4 = vrot.slane %v499_v2, %v1170_v63 }
 0x254   : > { %v503_v6 = vrot.slane %v498_v3, %v1170_v63 }
 0x255   : > { %v509_v7 = vmul.f32 %v507_v4, %v475_v40 }
 0x256   : > { %v508_v8 = vmul.f32 %v503_v6, %v474_v41 }
 0x257   : > { %v515_v9 = vadd.f32 %v737_v5, %v509_v7 }
 0x258   : > { %v514_v10 = vadd.f32 %v737_v5, %v508_v8 }
 0x259   : > { %v517_v12 = vmax.f32 %v515_v9, 0.0 }
 0x25a   : > { %v516_v11 = vmax.f32 %v514_v10, 0.0 }
 0x25c   : > { %816 = vmatprep.mubr.msk.f32.mxu0 %vm457_vm2, %v516_v11 }
 0x25d   : > { %817 = vmatmul.mubr.msk.f32.vlgmr.msra.gmra.mrb[2].mxu0 %vm457_vm2, %v517_v12 }
 0x330   : > { %v818_v14 = vpop.f32.mrb[2].mxu0 }
 0x331   : > { %v608_v15 = vadd.f32 %v818_v14, %v738_v13  ;;  %v602_v16 = vpop.f32.mrb[3].mxu0 }
 0x332   : > { %v603_v17 = vadd.f32 %v738_v13, %v602_v16 }
 0x333   : > { %v742_v63 = vmul.f32 -1.442695, %v608_v15 }
 0x334   : > { %v741_v18 = vmul.f32 -1.442695, %v603_v17 }
 0x335   : > { %917 = vpow2.f32 %v742_v63 }
 0x336   : > { %919 = vpow2.f32 %v741_v18 }
 0x33f   : > { %v918_v19 = vpop.eup %917 }
 0x340   : > { %v920_v20 = vpop.eup %919  ;;  %v618_v21 = vadd.f32 1.0, %v918_v19 }
 0x341   : > { %v617_v22 = vadd.f32 1.0, %v920_v20 }
 0x342   : > { %921 = vrcp.f32 %v618_v21 }
 0x343   : > { %923 = vrcp.f32 %v617_v22 }
 0x34c   : > { %v922_v23 = vpop.eup %921 }
 0x34d   : > { %v924_v25 = vpop.eup %923  ;;  %v624_v26 = vsub.f32 %v608_v15, %v922_v23 }
 0x34e   : > { %v623_v27 = vsub.f32 %v603_v17, %v924_v25 }
 0x34f   : > { %v630_v28 = vmul.f32 %v743_v24, %v624_v26 }
 0x350   : > { %v629_v29 = vmul.f32 %v743_v24, %v623_v27 }
 0x351   : > { %v632_v30 = vadd.f32 %v922_v23, %v630_v28 }
 0x352   : > { %v631_v31 = vadd.f32 %v924_v25, %v629_v29 }
 0x353   : > { %634 = vst [vmem:[%s206_s13 + $0x8] sm:$0xff] %v632_v30 }
 0x354   : > { %633 = vst [vmem:[%s206_s13] sm:$0xff] %v631_v31 }
 0x355   : > { %966 = shalt.err (!%p963_p7)
}
 0x356   : > { %s967_s29 = scalar_lea.hbm %s1222_s28, 256  ;;  %s971_s9 = scalar_lea.hbm %s1271_s4, 512 }
 0x357   : > { %p968_p8 = scmp.ne.s32.totalorder %s1222_s28, %s967_s29  ;;  %p972_p1 = scmp.lt.u32.totalorder %s1222_s28, %s1271_s4 }
 0x358   : > { %p973_p0 = scmp.lt.u32.totalorder %s971_s9, %s967_s29  ;;  %p975_p6 = scmp.lt.u32.totalorder %s967_s29, %s1222_s28 }
 0x359   : > { %p969_p11 = pnand %p968_p8, %p1282_p9 }
 0x35a   : > { %p974_p5 = por %p973_p0, %p972_p1 }
 0x35b   : > { %p970_p13 = pneg %p969_p11 }
 0x35c   : > { %p976_p10 = por %p975_p6, %p974_p5 }
 0x35e   : > { %p977_p12 = pnand %p976_p10, %p970_p13 }
 0x360   : > { %980 = shalt.err (!%p977_p12)
}
 0x361   : > { %s1025_s12 = smov 128   ;;  %s1026_s13 = smov 8  }
 0x362   : > { %859 = dma.vmem_to_hbm [thread:$0]  (%p1282_p9), %s1224_s14, 256, %s1222_s28, %s1226_s5, %s1025_s12, %s1025_s12, %s1026_s13  }
 0x363 PF: > { %p871_p2 = scmp.ge.s32.totalorder %s1019_s18, 2  ;;  %s664_s20 = sand.u32 1, %s1007_s15  }
 0x364   : > { %p1283_p3 = scmp.ne.s32.totalorder %s1276_s26, 0  ;;  %s665_s22 = scalar_lea.sflag [#allocation4], %s664_s20 }
 0x366   : > { %p866_p4 = pnand %p871_p2, %p1283_p3 }
 0x368   : > { %1002 = dma.done.wait (!%p866_p4), %s665_s22, 256  }
 0x369   : > { %1004 = vsyncadd (!%p866_p4), %s665_s22, 4294967040  ;;  %p15_p7 = scmp.ge.s32.totalorder %s1077_s21, 4   ;;  %s1284_s15 = smov %s1011_s16 }
 0x36a   : > { %s1285_s16 = smov %s1015_s17  ;;  %s1286_s17 = smov %s1088_s24 }
 0x36b   : > { %s1287_s18 = smov %s1077_s21  ;;  %17 = sbr.rel (!%p15_p7) target bundleno = 4 (0x4), region = 76 }
 0x372   :  { %670 = vsyncpa [#allocation3], 1 }
 0x373   :  { %672 = vsyncpa [#allocation3 + $0x1], 1 }
 0x374   :  { %673 = vsyncpa [#allocation4], 1 }
 0x375   :  { %675 = vsyncpa [#allocation4 + $0x1], 1 }

// kernel: tpu_custom_call.1
= control target key start
LH: loop header
LB: loop body
LE: loop exit
PB: predicated region body
PF: predicated region fallthrough
CT: control target
= control target key end

     0   :  { %9 = vsyncpa [#allocation3], 0  ;;  %s1267_s0 = inlined_call_operand.vmem [shape: f32[4,8,32], index: 0, kind: input, shape index: {}]   ;;  %s1268_s1 = inlined_call_operand.hbm [shape: f32[32,64], index: 1, kind: input, shape index: {}]   ;;  %s1269_s2 = inlined_call_operand.vmem [shape: f32[64,48], index: 2, kind: input, shape index: {}]   ;;  %s1270_s3 = inlined_call_operand.vmem [shape: f32[56,128], index: 3, kind: input, shape index: {}]   ;;  %s1271_s4 = inlined_call_operand.hbm [shape: f32[4,8,128], index: 4, kind: output, shape index: {}]  }
   0x1   :  { %10 = vsyncpa [#allocation4], 0 }
   0x2   :  { %12 = vsyncpa [#allocation4 + $0x1], 0  ;;  %s1052_s15 = smov 0   ;;  %s1054_s16 = smov 0  }
   0x3   :  { %s1056_s17 = smov 0   ;;  %s1058_s18 = smov 0  }
   0x4 LB: > { %s1073_s19 = sadd.s32 4294967295, %s1019_s18   ;;  %s723_s20 = sadd.s32 4294967294, %s1019_s18   ;;  %s1019_s18 = sphi %s1058_s18, %s1287_s18   ;;  %s1015_s17 = sphi %s1056_s17, %s1286_s17   ;;  %s1011_s16 = sphi %s1054_s16, %s1285_s16   ;;  %s1007_s15 = sphi %s1052_s15, %s1284_s15  }
   0x5   : > { %s1077_s21 = sadd.s32 1, %s1019_s18   ;;  %s114_s22 = sadd.s32 1, %s1015_s17 }
   0x6   : > { %s111_s23 = ssub.s32 %s1019_s18, %s1077_s21  ;;  %p124_p0 = scmp.ne.s32.totalorder %s1015_s17, %s1011_s16 }
   0x7   : > { %p112_p1 = scmp.eq.s32.totalorder %s111_s23, 0  ;;  %p125_p2 = scmp.eq.s32.totalorder %s1073_s19, 1 }
   0x8   : > { %p130_p3 = scmp.ne.s32.totalorder %s1011_s16, %s1007_s15  ;;  %p131_p4 = scmp.eq.s32.totalorder %s723_s20, 1 }
   0x9   : > { %s1088_s24 = scalar_select %p112_p1, %s1015_s17, %s114_s22  }
   0xa   : > { %p1090_p5 = por %p125_p2, %p124_p0  ;;  %p1094_p6 = por %p131_p4, %p130_p3 }
   0xb   : > { %p724_p7 = scmp.ge.s32.totalorder %s1019_s18, 1  ;;  %p138_p8 = scmp.lt.s32.totalorder %s1019_s18, 3 }
   0xc   : > { %s1275_s25 = scalar_select %p1090_p5, 1, 0 }
   0xd   : > { %s1276_s26 = scalar_select %p1094_p6, 1, 0 }
   0xe   : > { %p1272_p9 = scmp.eq.s32.totalorder %s1073_s19, 0  ;;  %p1101_p10 = pnand %p724_p7, %p138_p8 }
   0xf   : > { %s1021_s28 = smov [#allocation2]   ;;  %s925_s7 = scalar_lea.hbm %s1268_s1, 512 }
  0x10   : > { %s1277_s27 = scalar_select %p1101_p10, 1, 0 }
  0x11   : > { %s150_s29 = sshll.u32 %s1021_s28, 4  ;;  %p861_p11 = pneg %p1101_p10  ;;  %s151_s29 = int_to_ptr.vmem [resolvable:$true] %s150_s29 }
  0x12   : > { %p926_p13 = scmp.ne.s32.totalorder %s1268_s1, %s925_s7  ;;  %p932_p3 = scmp.lt.u32.totalorder %s925_s7, %s1268_s1 }
  0x13   : > { %p1109_p12 = pnand %p1272_p9, %p861_p11 }
  0x15   : > { %p927_p0 = pneg %p1109_p12 }
  0x17   : > { %p928_p1 = pnand %p927_p0, %p926_p13 }
  0x19   : > { %p929_p2 = pneg %p928_p1 }
  0x1b   : > { %p934_p4 = pnand %p932_p3, %p929_p2 }
  0x1d   : > { %937 = shalt.err (!%p934_p4)
}
  0x1e   : > { %s938_s12 = scalar_lea.vmem %s151_s29, 512  ;;  %p946_p9 = scmp.lt.s32.totalorder %s151_s29, %s151_s29 }
  0x1f   : > { %p939_p7 = scmp.ne.s32.totalorder %s151_s29, %s938_s12  ;;  %p947_p6 = scmp.lt.s32.totalorder %s938_s12, %s938_s12 }
  0x21   : > { %p941_p8 = pnand %p939_p7, %p927_p0  ;;  %p948_p5 = por %p947_p6, %p946_p9 }
  0x23   : > { %p942_p11 = pneg %p941_p8 }
  0x25   : > { %p949_p10 = pnand %p948_p5, %p942_p11 }
  0x27   : > { %952 = shalt.err (!%p949_p10)
}
  0x28   : > { %s1022_s13 = smov 128   ;;  %s1023_s14 = smov 8  }
  0x29   : > { %864 = dma.hbm_to_vmem [thread:$0]  (!%p1109_p12), %s1268_s1, 512, %s151_s29, [#allocation3], %s1022_s13, %s1022_s13, %s1023_s14  }
  0x2a   : > { %p1279_p13 = scmp.ne.s32.totalorder %s1277_s27, 0 }
  0x2b   : > { %p1280_p1 = scmp.eq.s32.totalorder (!%p1279_p13), %s1073_s19, 0 }
  0x2c   : > { %181 = sbr.rel (%p1279_p13) target bundleno = 867 (0x363), region = 36 }
  0x33   : > { %998 = dma.done.wait (%p1280_p1), [#allocation3], 512   ;;  %p1281_p0 = pmov %p1280_p1 }
  0x34   : > { %s730_s23 = sshll.u32 %s1073_s19, 1  ;;  %vm222_vm0 = vcmask 261120   ;;  %v218_v0 = vld [vmem:[#allocation2] sm:$0xff]  ;;  %v219_v1 = vld [vmem:[#allocation2 + $0x8] sm:$0xff]  ;;  %v220_v2 = vld [vmem:[#allocation2 + $0x10] sm:$0xff]  ;;  %vm304_vm1 = vcmask 523264   ;;  %v348_v60 = vlaneseq }
  0x35   : > { %1000 = vsyncadd (%p1281_p0), [#allocation3], 4294966784  ;;  %p208_p5 = scmp.lt.s32.totalorder %s730_s23, 3  ;;  %v819_v3 = vpack.c.bf16 %v219_v1, %v218_v0  ;;  %v221_v4 = vld [vmem:[#allocation2 + $0x18] sm:$0xff]  ;;  %v368_v8 = vld [vmem:[%s1269_s2] sm:$0xff]  ;;  %vm457_vm2 = vcmask 392192  }
  0x36   : > { %v823_v6 = vpack.c.bf16 %v221_v4, %v220_v2  ;;  %v369_v9 = vld [vmem:[%s1269_s2 + $0x8] sm:$0xff]  ;;  %v370_v11 = vld [vmem:[%s1269_s2 + $0x10] sm:$0xff]  ;;  %v371_v12 = vld [vmem:[%s1269_s2 + $0x18] sm:$0xff]  ;;  %v349_v61 = vshrl.u32 %v348_v60, 7  ;;  %s204_s9 = sand.u32 1, %s1011_s16   ;;  %s749_s20 = sshll.u32 %s1073_s19, 8 }
  0x37   : > { %s1289_s23 = smov (!%p208_p5, %s730_s23), 3  ;;  %820 = vmatprep.subr.bf16.mxu0 %v819_v3  ;;  %v827_v10 = vpack.c.bf16 %v369_v9, %v368_v8  ;;  %v831_v13 = vpack.c.bf16 %v371_v12, %v370_v11  ;;  %v372_v14 = vld [vmem:[%s1269_s2 + $0x20] sm:$0xff]  ;;  %v373_v15 = vld [vmem:[%s1269_s2 + $0x28] sm:$0xff]  ;;  %v374_v17 = vld [vmem:[%s1269_s2 + $0x30] sm:$0xff]  ;;  %s729_s10 = sshll.u32 %s204_s9, 4 }
  0x38   : > { %s731_s28 = sshll.u32 %s1289_s23, 3  ;;  %822 = vmatpush3.bf16.msra.mxu0 %v819_v3  ;;  %v835_v16 = vpack.c.bf16 %v373_v15, %v372_v14  ;;  %v375_v18 = vld [vmem:[%s1269_s2 + $0x38] sm:$0xff]  ;;  %v216_v62 = vld [vmem:[%s1270_s3] sm:$0x1]  ;;  %v1170_v63 = vsub.s32 0, %v349_v61  ;;  %v519_v14 = vld [vmem:[%s1270_s3 + $0x10] sm:$0xff] }
  0x39   : > { %s211_s6 = scalar_lea.vmem %s1267_s0, %s731_s28  ;;  %824 = vmatprep.subr.bf16.mxu0 %v823_v6  ;;  %828 = vmatprep.subr.bf16.mxu1 %v827_v10  ;;  %v839_v19 = vpack.c.bf16 %v375_v18, %v374_v17  ;;  %v521_v17 = vld [vmem:[%s1270_s3 + $0x20] sm:$0xff]  ;;  %s206_s13 = scalar_lea.vmem [#allocation5], %s729_s10 }
  0x3a   : > { %v214_v5 = vld [vmem:[%s211_s6] sm:$0xff]  ;;  %v215_v7 = vld [vmem:[%s211_s6 + $0x8] sm:$0xff]  ;;  %830 = vmatpush3.bf16.msra.mxu1 %v827_v10  ;;  %s649_s14 = sshll.u32 %s206_s13, 4  ;;  %s1222_s28 = scalar_lea.hbm %s1271_s4, %s749_s20  ;;  %s1224_s14 = int_to_ptr.vmem [resolvable:$true] %s649_s14 }
  0x3b   : > { %782 = vmatprep.mubr.msk.f32.mxu0 %vm222_vm0, %v214_v5  ;;  %832 = vmatprep.subr.bf16.mxu1 %v831_v13  ;;  %s1226_s5 = scalar_lea.sflag [#allocation4], %s204_s9  ;;  %s953_s30 = scalar_lea.vmem %s1224_s14, 256 }
  0x3c   : > { %826 = vmatpush3.bf16.msra.mxu0 %v823_v6  ;;  %v734_v6 = vld [vmem:[%s1270_s3 + $0x1] ss:$0 sm:$0xff]  ;;  %p954_p6 = scmp.ne.s32.totalorder %s1224_s14, %s953_s30  ;;  %p1282_p9 = scmp.ne.s32.totalorder %s1275_s25, 0 }
  0x3d   : > { %s1024_s19 = smov [#allocation5]  }
  0x3e   : > { %834 = vmatpush3.bf16.msra.mxu1 %v831_v13  ;;  %v518_v13 = vld [vmem:[%s1270_s3 + $0x8] sm:$0xff]  ;;  %p955_p10 = pnand %p954_p6, %p1282_p9  ;;  %s957_s6 = sshll.u32 %s1024_s19, 4  ;;  %s958_s6 = int_to_ptr.vmem [resolvable:$false] %s957_s6 }
  0x3f   : > { %783 = vmatmul.mubr.msk.f32.vlgmr.msra.gmra.mrb[0].mxu0 %vm222_vm0, %v215_v7  ;;  %836 = vmatprep.subr.bf16.mxu1 %v835_v16  ;;  %v843_v15 = vpack.c.bf16 %v519_v14, %v518_v13  ;;  %v738_v13 = vld [vmem:[%s1270_s3 + $0x4] ss:$0 sm:$0xff]  ;;  %s959_s27 = scalar_lea.vmem %s958_s6, 512  ;;  %p960_p2 = scmp.lt.s32.totalorder %s1224_s14, %s958_s6 }
  0x40   : > { %p956_p12 = pneg %p955_p10  ;;  %p961_p3 = scmp.lt.s32.totalorder %s959_s27, %s953_s30 }
  0x41   : > { %844 = vmatprep.subr.bf16.mxu0 %v843_v15 }
  0x42   : > { %838 = vmatpush3.bf16.msra.mxu1 %v835_v16  ;;  %846 = vmatpush3.bf16.msra.mxu0 %v843_v15  ;;  %v520_v16 = vld [vmem:[%s1270_s3 + $0x18] sm:$0xff]  ;;  %p962_p4 = por %p961_p3, %p960_p2 }
  0x43   : > { %840 = vmatprep.subr.bf16.mxu1 %v839_v19  ;;  %v847_v18 = vpack.c.bf16 %v521_v17, %v520_v16 }
  0x44   : > { %p963_p7 = pnand %p962_p4, %p956_p12 }
  0x45   : > { %848 = vmatprep.subr.bf16.mxu0 %v847_v18 }
  0x46   : > { %842 = vmatpush3.bf16.msra.mxu1 %v839_v19  ;;  %850 = vmatpush3.bf16.msra.mxu0 %v847_v18  ;;  %v522_v19 = vld [vmem:[%s1270_s3 + $0x28] sm:$0xff] }
 0x112   : > { %v784_v20 = vpop.f32.mrb[0].mxu0 }
 0x113   : > { %v312_v21 = vsel %vm304_vm1, %v784_v20, 0.0  ;;  %v295_v22 = vpop.f32.mrb[1].mxu0 }
 0x114   : > { %v313_v23 = vrot.slane %v312_v21, 4  ;;  %v305_v24 = vsel %vm304_vm1, %v295_v22, 0.0 }
 0x115   : > { %v306_v25 = vrot.slane %v305_v24, 4 }
 0x116   : > { %v314_v26 = vadd.f32 %v313_v23, %v312_v21 }
 0x117   : > { %v307_v27 = vadd.f32 %v306_v25, %v305_v24 }
 0x118   : > { %v315_v28 = vrot.slane %v314_v26, 2 }
 0x119   : > { %v308_v29 = vrot.slane %v307_v27, 2 }
 0x11a   : > { %v316_v30 = vadd.f32 %v315_v28, %v314_v26 }
 0x11b   : > { %v309_v31 = vadd.f32 %v308_v29, %v307_v27 }
 0x11c   : > { %v317_v32 = vrot.slane %v316_v30, 1 }
 0x11d   : > { %v310_v33 = vrot.slane %v309_v31, 1 }
 0x11e   : > { %v318_v34 = vadd.f32 %v317_v32, %v316_v30 }
 0x11f   : > { %v311_v35 = vadd.f32 %v310_v33, %v309_v31 }
 0x120   : > { %v321_v36 = vmul.f32 0.125, %v318_v34 }
 0x121   : > { %v320_v37 = vmul.f32 0.125, %v311_v35 }
 0x122   : > { %v323_v38 = vsub.f32 %v784_v20, %v321_v36  ;;  %v523_v20 = vld [vmem:[%s1270_s3 + $0x30] sm:$0xff] }
 0x123   : > { %v322_v39 = vsub.f32 %v295_v22, %v320_v37  ;;  %v851_v21 = vpack.c.bf16 %v523_v20, %v522_v19 }
 0x124   : > { %v325_v40 = vmul.f32 %v323_v38, %v323_v38 }
 0x125   : > { %v324_v41 = vmul.f32 %v322_v39, %v322_v39  ;;  %852 = vmatprep.subr.bf16.mxu0 %v851_v21 }
 0x126   : > { %v333_v42 = vsel %vm304_vm1, %v325_v40, 0.0  ;;  %854 = vmatpush3.bf16.msra.mxu0 %v851_v21 }
 0x127   : > { %v334_v43 = vrot.slane %v333_v42, 4  ;;  %v326_v44 = vsel %vm304_vm1, %v324_v41, 0.0 }
 0x128   : > { %v327_v45 = vrot.slane %v326_v44, 4 }
 0x129   : > { %v335_v46 = vadd.f32 %v334_v43, %v333_v42 }
 0x12a   : > { %v328_v47 = vadd.f32 %v327_v45, %v326_v44 }
 0x12b   : > { %v336_v48 = vrot.slane %v335_v46, 2 }
 0x12c   : > { %v329_v49 = vrot.slane %v328_v47, 2 }
 0x12d   : > { %v337_v50 = vadd.f32 %v336_v48, %v335_v46 }
 0x12e   : > { %v330_v51 = vadd.f32 %v329_v49, %v328_v47 }
 0x12f   : > { %v338_v52 = vrot.slane %v337_v50, 1 }
 0x130   : > { %v331_v53 = vrot.slane %v330_v51, 1 }
 0x131   : > { %v339_v54 = vadd.f32 %v338_v52, %v337_v50 }
 0x132   : > { %v332_v55 = vadd.f32 %v331_v53, %v330_v51 }
 0x133   : > { %v341_v56 = vmul.f32 0.125, %v339_v54 }
 0x134   : > { %v340_v57 = vmul.f32 0.125, %v332_v55 }
 0x135   : > { %v343_v58 = vadd.f32 0.0001, %v341_v56 }
 0x136   : > { %v342_v59 = vadd.f32 0.0001, %v340_v57 }
 0x137   : > { %909 = vrsqrt.f32 %v343_v58 }
 0x138   : > { %911 = vrsqrt.f32 %v342_v59 }
 0x141   : > { %v910_v0 = vpop.eup %909 }
 0x142   : > { %v912_v1 = vpop.eup %911  ;;  %v347_v2 = vmul.f32 %v910_v0, %v216_v62 }
 0x143   : > { %v346_v3 = vmul.f32 %v912_v1, %v216_v62  ;;  %v366_v62 = vld [vmem:[%s1270_s3 + $0x2] sm:$0x1] }
 0x144   : > { %v355_v4 = vrot.slane %v347_v2, %v1170_v63 }
 0x145   : > { %v351_v5 = vrot.slane %v346_v3, %v1170_v63 }
 0x146   : > { %v357_v7 = vmul.f32 %v355_v4, %v323_v38 }
 0x147   : > { %v356_v8 = vmul.f32 %v351_v5, %v322_v39  ;;  %v737_v5 = vld [vmem:[%s1270_s3 + $0x3] ss:$0 sm:$0xff] }
 0x148   : > { %v363_v9 = vadd.f32 %v734_v6, %v357_v7 }
 0x149   : > { %v362_v10 = vadd.f32 %v734_v6, %v356_v8 }
 0x14a   : > { %v365_v12 = vmax.f32 %v363_v9, 0.0 }
 0x14b   : > { %v364_v11 = vmax.f32 %v362_v10, 0.0 }
 0x14d   : > { %801 = vmatprep.mubr.msk.f32.mxu1 %vm304_vm1, %v364_v11 }
 0x14e   : > { %802 = vmatmul.mubr.msk.f32.vlgmr.msra.gmra.mrb[0].mxu1 %vm304_vm1, %v365_v12 }
 0x221   : > { %v803_v22 = vpop.f32.mrb[0].mxu1 }
 0x222   : > { %v465_v23 = vsel %vm457_vm2, %v803_v22, 0.0  ;;  %v448_v24 = vpop.f32.mrb[1].mxu1 }
 0x223   : > { %v466_v25 = vrot.slane %v465_v23, 4  ;;  %v458_v26 = vsel %vm457_vm2, %v448_v24, 0.0 }
 0x224   : > { %v459_v27 = vrot.slane %v458_v26, 4 }
 0x225   : > { %v467_v28 = vadd.f32 %v466_v25, %v465_v23 }
 0x226   : > { %v460_v29 = vadd.f32 %v459_v27, %v458_v26 }
 0x227   : > { %v468_v30 = vrot.slane %v467_v28, 2 }
 0x228   : > { %v461_v31 = vrot.slane %v460_v29, 2 }
 0x229   : > { %v469_v32 = vadd.f32 %v468_v30, %v467_v28 }
 0x22a   : > { %v462_v33 = vadd.f32 %v461_v31, %v460_v29 }
 0x22b   : > { %v470_v34 = vrot.slane %v469_v32, 1 }
 0x22c   : > { %v463_v35 = vrot.slane %v462_v33, 1 }
 0x22d   : > { %v471_v36 = vadd.f32 %v470_v34, %v469_v32 }
 0x22e   : > { %v464_v37 = vadd.f32 %v463_v35, %v462_v33 }
 0x22f   : > { %v473_v38 = vmul.f32 0.125, %v471_v36 }
 0x230   : > { %v472_v39 = vmul.f32 0.125, %v464_v37 }
 0x231   : > { %v475_v40 = vsub.f32 %v803_v22, %v473_v38 }
 0x232   : > { %v474_v41 = vsub.f32 %v448_v24, %v472_v39  ;;  %v743_v24 = vld [vmem:[%s1270_s3 + $0x5] ss:$0 sm:$0xff] }
 0x233   : > { %v477_v42 = vmul.f32 %v475_v40, %v475_v40 }
 0x234   : > { %v476_v43 = vmul.f32 %v474_v41, %v474_v41 }
 0x235   : > { %v485_v44 = vsel %vm457_vm2, %v477_v42, 0.0 }
 0x236   : > { %v486_v45 = vrot.slane %v485_v44, 4  ;;  %v478_v46 = vsel %vm457_vm2, %v476_v43, 0.0 }
 0x237   : > { %v479_v47 = vrot.slane %v478_v46, 4 }
 0x238   : > { %v487_v48 = vadd.f32 %v486_v45, %v485_v44 }
 0x239   : > { %v480_v49 = vadd.f32 %v479_v47, %v478_v46 }
 0x23a   : > { %v488_v50 = vrot.slane %v487_v48, 2 }
 0x23b   : > { %v481_v51 = vrot.slane %v480_v49, 2 }
 0x23c   : > { %v489_v52 = vadd.f32 %v488_v50, %v487_v48 }
 0x23d   : > { %v482_v53 = vadd.f32 %v481_v51, %v480_v49 }
 0x23e   : > { %v490_v54 = vrot.slane %v489_v52, 1 }
 0x23f   : > { %v483_v55 = vrot.slane %v482_v53, 1 }
 0x240   : > { %v491_v56 = vadd.f32 %v490_v54, %v489_v52 }
 0x241   : > { %v484_v57 = vadd.f32 %v483_v55, %v482_v53 }
 0x242   : > { %v493_v58 = vmul.f32 0.125, %v491_v56 }
 0x243   : > { %v492_v59 = vmul.f32 0.125, %v484_v57 }
 0x244   : > { %v495_v60 = vadd.f32 0.0001, %v493_v58 }
 0x245   : > { %v494_v61 = vadd.f32 0.0001, %v492_v59 }
 0x246   : > { %913 = vrsqrt.f32 %v495_v60 }
 0x247   : > { %915 = vrsqrt.f32 %v494_v61 }
 0x250   : > { %v914_v0 = vpop.eup %913 }
 0x251   : > { %v916_v1 = vpop.eup %915  ;;  %v499_v2 = vmul.f32 %v914_v0, %v366_v62 }
 0x252   : > { %v498_v3 = vmul.f32 %v916_v1, %v366_v62 }
 0x253   : > { %v507_v4 = vrot.slane %v499_v2, %v1170_v63 }
 0x254   : > { %v503_v6 = vrot.slane %v498_v3, %v1170_v63 }
 0x255   : > { %v509_v7 = vmul.f32 %v507_v4, %v475_v40 }
 0x256   : > { %v508_v8 = vmul.f32 %v503_v6, %v474_v41 }
 0x257   : > { %v515_v9 = vadd.f32 %v737_v5, %v509_v7 }
 0x258   : > { %v514_v10 = vadd.f32 %v737_v5, %v508_v8 }
 0x259   : > { %v517_v12 = vmax.f32 %v515_v9, 0.0 }
 0x25a   : > { %v516_v11 = vmax.f32 %v514_v10, 0.0 }
 0x25c   : > { %816 = vmatprep.mubr.msk.f32.mxu0 %vm457_vm2, %v516_v11 }
 0x25d   : > { %817 = vmatmul.mubr.msk.f32.vlgmr.msra.gmra.mrb[2].mxu0 %vm457_vm2, %v517_v12 }
 0x330   : > { %v818_v14 = vpop.f32.mrb[2].mxu0 }
 0x331   : > { %v608_v15 = vadd.f32 %v818_v14, %v738_v13  ;;  %v602_v16 = vpop.f32.mrb[3].mxu0 }
 0x332   : > { %v603_v17 = vadd.f32 %v738_v13, %v602_v16 }
 0x333   : > { %v742_v63 = vmul.f32 -1.442695, %v608_v15 }
 0x334   : > { %v741_v18 = vmul.f32 -1.442695, %v603_v17 }
 0x335   : > { %917 = vpow2.f32 %v742_v63 }
 0x336   : > { %919 = vpow2.f32 %v741_v18 }
 0x33f   : > { %v918_v19 = vpop.eup %917 }
 0x340   : > { %v920_v20 = vpop.eup %919  ;;  %v618_v21 = vadd.f32 1.0, %v918_v19 }
 0x341   : > { %v617_v22 = vadd.f32 1.0, %v920_v20 }
 0x342   : > { %921 = vrcp.f32 %v618_v21 }
 0x343   : > { %923 = vrcp.f32 %v617_v22 }
 0x34c   : > { %v922_v23 = vpop.eup %921 }
 0x34d   : > { %v924_v25 = vpop.eup %923  ;;  %v624_v26 = vsub.f32 %v608_v15, %v922_v23 }
 0x34e   : > { %v623_v27 = vsub.f32 %v603_v17, %v924_v25 }
 0x34f   : > { %v630_v28 = vmul.f32 %v743_v24, %v624_v26 }
 0x350   : > { %v629_v29 = vmul.f32 %v743_v24, %v623_v27 }
 0x351   : > { %v632_v30 = vadd.f32 %v922_v23, %v630_v28 }
 0x352   : > { %v631_v31 = vadd.f32 %v924_v25, %v629_v29 }
 0x353   : > { %634 = vst [vmem:[%s206_s13 + $0x8] sm:$0xff] %v632_v30 }
 0x354   : > { %633 = vst [vmem:[%s206_s13] sm:$0xff] %v631_v31 }
 0x355   : > { %966 = shalt.err (!%p963_p7)
}
 0x356   : > { %s967_s29 = scalar_lea.hbm %s1222_s28, 256  ;;  %s971_s9 = scalar_lea.hbm %s1271_s4, 512 }
 0x357   : > { %p968_p8 = scmp.ne.s32.totalorder %s1222_s28, %s967_s29  ;;  %p972_p1 = scmp.lt.u32.totalorder %s1222_s28, %s1271_s4 }
 0x358   : > { %p973_p0 = scmp.lt.u32.totalorder %s971_s9, %s967_s29  ;;  %p975_p6 = scmp.lt.u32.totalorder %s967_s29, %s1222_s28 }
 0x359   : > { %p969_p11 = pnand %p968_p8, %p1282_p9 }
 0x35a   : > { %p974_p5 = por %p973_p0, %p972_p1 }
 0x35b   : > { %p970_p13 = pneg %p969_p11 }
 0x35c   : > { %p976_p10 = por %p975_p6, %p974_p5 }
 0x35e   : > { %p977_p12 = pnand %p976_p10, %p970_p13 }
 0x360   : > { %980 = shalt.err (!%p977_p12)
}
 0x361   : > { %s1025_s12 = smov 128   ;;  %s1026_s13 = smov 8  }
 0x362   : > { %859 = dma.vmem_to_hbm [thread:$0]  (%p1282_p9), %s1224_s14, 256, %s1222_s28, %s1226_s5, %s1025_s12, %s1025_s12, %s1026_s13  }
 0x363 PF: > { %p871_p2 = scmp.ge.s32.totalorder %s1019_s18, 2  ;;  %s664_s20 = sand.u32 1, %s1007_s15  }
 0x364   : > { %p1283_p3 = scmp.ne.s32.totalorder %s1276_s26, 0  ;;  %s665_s22 = scalar_lea.sflag [#allocation4], %s664_s20 }
 0x366   : > { %p866_p4 = pnand %p871_p2, %p1283_p3 }
 0x368   : > { %1002 = dma.done.wait (!%p866_p4), %s665_s22, 256  }
 0x369   : > { %1004 = vsyncadd (!%p866_p4), %s665_s22, 4294967040  ;;  %p15_p7 = scmp.ge.s32.totalorder %s1077_s21, 4   ;;  %s1284_s15 = smov %s1011_s16 }
 0x36a   : > { %s1285_s16 = smov %s1015_s17  ;;  %s1286_s17 = smov %s1088_s24 }
 0x36b   : > { %s1287_s18 = smov %s1077_s21  ;;  %17 = sbr.rel (!%p15_p7) target bundleno = 4 (0x4), region = 76 }
 0x372   :  { %670 = vsyncpa [#allocation3], 1 }
 0x373   :  { %672 = vsyncpa [#allocation3 + $0x1], 1 }
 0x374   :  { %673 = vsyncpa [#allocation4], 1 }
 0x375   :  { %675 = vsyncpa [#allocation4 + $0x1], 1 }

</bundles_post_ra>
